<compile_context>
chip_gen: v5e
topology: v5e:2x2
jax: 0.10.0
libtpu: 0.0.40
codegen_flags: <defaults>
</compile_context>

<pallas_src>
import functools

import jax
import jax.numpy as jnp
from jax.experimental import pallas as pl
from jax.experimental.pallas import tpu as pltpu


# --------------------------------------------------------------------------
# helpers
# --------------------------------------------------------------------------
def _round_up(n, m):
    return ((n + m - 1) // m) * m


def _pad_last(x3, target):
    pad = target - x3.shape[-1]
    if pad == 0:
        return x3
    return jnp.pad(x3, ((0, 0), (0, 0), (0, pad)))


def _vmem_capacity_bytes():
    try:
        return int(pltpu.get_tpu_info().vmem_capacity_bytes)
    except Exception:
        return 64 * 2**20  # conservative (v7x per-TC VMEM)


# --------------------------------------------------------------------------
# kernels
# --------------------------------------------------------------------------
def _fused_kernel(*refs, d_model, inv_hw, has_ht):
    """One grid step == one batch element, fully fused pool->alpha->affine."""
    if has_ht:
        (x_ref, y_ref, ht_ref, wbT_ref, bb_ref, whT_ref,
         wfcT_ref, bfc_ref, bn_s_ref, bn_b_ref, out_ref) = refs
    else:
        (x_ref, y_ref, wbT_ref, bb_ref,
         wfcT_ref, bfc_ref, bn_s_ref, bn_b_ref, out_ref) = refs

    xf = x_ref[...].astype(jnp.float32)           # (1, C, HWp)
    yf = y_ref[...].astype(jnp.float32)           # (1, cy, HWp), cy in {1, C}

    # global average pool of Base * y_ (f32 accumulation, divide by true HW)
    pooled = jnp.sum(xf * yf, axis=-1) * inv_hw   # (1, C)

    # l_b : Linear(C -> R)
    base = jnp.dot(pooled, wbT_ref[...],
                   preferred_element_type=jnp.float32) + bb_ref[...]      # (1, R)

    if has_ht:
        htf = ht_ref[...][:, 0, :].astype(jnp.float32)                    # (1, C)
        base = base + jnp.dot(htf, whT_ref[...],
                              preferred_element_type=jnp.float32)

    # channel_fc : Tanh -> Linear(R -> C) -> Softmax(dim=1), then * d_model
    z = jnp.tanh(base)
    logits = jnp.dot(z, wfcT_ref[...],
                     preferred_element_type=jnp.float32) + bfc_ref[...]   # (1, C)
    logits = logits - jnp.max(logits, axis=-1, keepdims=True)
    e = jnp.exp(logits)
    # NOTE: exact divide kept (approx reciprocal would cost ~2^-12 rel. error
    # in alpha; the divide is off the DMA critical path anyway).
    alpha = (e / jnp.sum(e, axis=-1, keepdims=True)) * d_model            # (1, C)

    # fold alpha + BN + residual into one per-channel affine
    scale = 1.0 + alpha * bn_s_ref[...]                                   # (1, C)
    shift = bn_b_ref[...]                                                 # (1, C)
    out_ref[...] = (xf * scale[:, :, None] + shift[:, :, None]).astype(out_ref.dtype)


def _pool_kernel(x_ref, y_ref, psum_ref):
    """Pass 1 (two-pass path): accumulate sum(Base*y_) over HW tiles."""
    @pl.when(pl.program_id(1) == 0)
    def _():
        psum_ref[...] = jnp.zeros_like(psum_ref)

    xf = x_ref[...].astype(jnp.float32)           # (1, C, THW)
    yf = y_ref[...].astype(jnp.float32)           # (1, cy, THW)
    psum_ref[...] += jnp.sum(xf * yf, axis=-1)[:, None, :]


def _affine_kernel(x_ref, scale_ref, shift_ref, out_ref):
    """Pass 2 (two-pass path): out = Base * scale_c + shift_c over HW tiles."""
    xf = x_ref[...].astype(jnp.float32)           # (1, C, THW)
    out_ref[...] = (xf * scale_ref[...] + shift_ref[...]).astype(out_ref.dtype)


# --------------------------------------------------------------------------
# host-side alpha (tiny (B,C) math — used by two-pass / multiply=False paths)
# --------------------------------------------------------------------------
def _alpha_host(pooled, params, h_t, d_model):
    f32 = jnp.float32
    base = pooled @ params["wb"].astype(f32).T + params["bb"].astype(f32)
    if h_t is not None:
        base = base + h_t.astype(f32) @ params["wh"].astype(f32).T
    logits = jnp.tanh(base) @ params["wfc"].astype(f32).T + params["bfc"].astype(f32)
    return jax.nn.softmax(logits, axis=1) * d_model


# --------------------------------------------------------------------------
# wrapper
# --------------------------------------------------------------------------
def channel_attention_layer(Base, y_, params, h_t=None, *, eps=1e-5,
                            multiply=True, force_two_pass=False, hw_tile=None):
    """Base: (B, C, H, W) NCHW (any float dtype); y_: broadcastable to Base;
    h_t: (B, C) or None."""
    b, c, h, w = Base.shape
    hw = h * w
    d_model = c
    in_dtype = Base.dtype
    itemsize = jnp.dtype(in_dtype).itemsize
    f32 = jnp.float32
    r = params["wb"].shape[0]

    # (B, C, HW) view; keep y_ at its native channel width (no HBM broadcast).
    base3 = Base.reshape(b, c, hw)
    y4 = jnp.asarray(y_)
    if y4.ndim != 4 or y4.shape[1] not in (1, c):
        y4 = jnp.broadcast_to(y4, Base.shape)
    cy = y4.shape[1]
    y4 = jnp.broadcast_to(y4, (b, cy, h, w))      # batch/spatial only
    y3 = y4.reshape(b, cy, hw)

    # Pre-transposed linear weights (PyTorch stores (out, in)) + folded BN.
    wbT = params["wb"].astype(f32).T                                  # (C, R)
    bb = params["bb"].astype(f32).reshape(1, r)
    whT = params["wh"].astype(f32).T                                  # (C, R)
    wfcT = params["wfc"].astype(f32).T                                # (R, C)
    bfc = params["bfc"].astype(f32).reshape(1, c)
    bn_scale1 = params["bn_gamma"].astype(f32) * jax.lax.rsqrt(
        params["bn_var"].astype(f32) + eps)                           # (C,)
    bn_shift1 = params["bn_beta"].astype(f32) - params["bn_mean"].astype(f32) * bn_scale1
    bn_s = bn_scale1.reshape(1, c)
    bn_b = bn_shift1.reshape(1, c)

    # ---- path selection: fused single pass if the per-batch block fits VMEM.
    hw_pad = _round_up(hw, 128)                   # lane-dense last dim
    fused_est = (2 * (2 * c * hw_pad + cy * hw_pad) * itemsize        # dbl-buffered in/out
                 + 2 * c * hw_pad * 4                                 # f32 temporaries
                 + (1 << 20))                                         # weights + slack
    capacity = _vmem_capacity_bytes()
    use_fused = multiply and (not force_two_pass) and fused_est <= int(0.75 * capacity)

    if use_fused:
        base3p = _pad_last(base3, hw_pad)
        y3p = _pad_last(y3, hw_pad)
        has_ht = h_t is not None

        args = [base3p, y3p]
        in_specs = [
            pl.BlockSpec((1, c, hw_pad), lambda i: (i, 0, 0)),        # Base
            pl.BlockSpec((1, cy, hw_pad), lambda i: (i, 0, 0)),       # y_
        ]
        if has_ht:
            args.append(jnp.asarray(h_t).astype(f32).reshape(b, 1, c))
            in_specs.append(pl.BlockSpec((1, 1, c), lambda i: (i, 0, 0)))
        args += [wbT, bb]
        in_specs += [pl.BlockSpec((c, r), lambda i: (0, 0)),
                     pl.BlockSpec((1, r), lambda i: (0, 0))]
        if has_ht:
            args.append(whT)
            in_specs.append(pl.BlockSpec((c, r), lambda i: (0, 0)))
        args += [wfcT, bfc, bn_s, bn_b]
        in_specs += [pl.BlockSpec((r, c), lambda i: (0, 0)),
                     pl.BlockSpec((1, c), lambda i: (0, 0)),
                     pl.BlockSpec((1, c), lambda i: (0, 0)),
                     pl.BlockSpec((1, c), lambda i: (0, 0))]

        vmem_limit = int(min(0.9 * capacity, max(32 * 2**20, fused_est * 1.25)))

        out3 = pl.pallas_call(
            functools.partial(_fused_kernel, d_model=float(d_model),
                              inv_hw=1.0 / hw, has_ht=has_ht),
            out_shape=jax.ShapeDtypeStruct((b, c, hw_pad), in_dtype),
            grid=(b,),
            in_specs=in_specs,
            out_specs=pl.BlockSpec((1, c, hw_pad), lambda i: (i, 0, 0)),
            compiler_params=pltpu.CompilerParams(
                dimension_semantics=("parallel",),
                vmem_limit_bytes=vmem_limit),
        )(*args)
        return out3[:, :, :hw].reshape(b, c, h, w)

    # ---------------- two-pass (HW-tiled) path / multiply=False ------------
    if hw_tile is None:
        target_bytes = 2 * 2**20                  # ~2 MiB of Base per block
        thw = (target_bytes // max(1, c * itemsize)) // 128 * 128
        thw = max(128, min(thw, hw_pad))
    else:
        thw = max(128, _round_up(hw_tile, 128))
    n_hw = pl.cdiv(hw, thw)
    hw_pad2 = n_hw * thw
    base3p = _pad_last(base3, hw_pad2)
    y3p = _pad_last(y3, hw_pad2)

    # pass 1: pooled partial sums (accumulated over the trailing HW-tile axis)
    psum = pl.pallas_call(
        _pool_kernel,
        out_shape=jax.ShapeDtypeStruct((b, 1, c), jnp.float32),
        grid=(b, n_hw),
        in_specs=[pl.BlockSpec((1, c, thw), lambda i, t: (i, 0, t)),
                  pl.BlockSpec((1, cy, thw), lambda i, t: (i, 0, t))],
        out_specs=pl.BlockSpec((1, 1, c), lambda i, t: (i, 0, 0)),
        compiler_params=pltpu.CompilerParams(
            dimension_semantics=("parallel", "arbitrary")),
    )(base3p, y3p)
    pooled = psum.reshape(b, c) * (1.0 / hw)

    # alpha for all B: a couple of (B,C)@(C,R) matmuls — plain XLA is fine.
    alpha = _alpha_host(pooled, params, h_t, float(d_model))          # (B, C)
    if not multiply:
        return alpha.reshape(b, c, 1, 1).astype(in_dtype)

    scale = (1.0 + alpha * bn_s).reshape(b, c, 1).astype(f32)         # (B, C, 1)
    shift = bn_b.reshape(1, c, 1)

    # pass 2: fused affine (alpha + BN + residual) over HW tiles
    out3 = pl.pallas_call(
        _affine_kernel,
        out_shape=jax.ShapeDtypeStruct((b, c, hw_pad2), in_dtype),
        grid=(b, n_hw),
        in_specs=[pl.BlockSpec((1, c, thw), lambda i, t: (i, 0, t)),
                  pl.BlockSpec((1, c, 1), lambda i, t: (i, 0, 0)),
                  pl.BlockSpec((1, c, 1), lambda i, t: (0, 0, 0))],
        out_specs=pl.BlockSpec((1, c, thw), lambda i, t: (i, 0, t)),
        compiler_params=pltpu.CompilerParams(
            dimension_semantics=("parallel", "parallel")),
    )(base3p, scale, shift)
    return out3[:, :, :hw].reshape(b, c, h, w)


# --------------------------------------------------------------------------
# pure-JAX reference (mirrors the PyTorch forward, eval-mode BN)
# --------------------------------------------------------------------------
def _reference(Base, y_, params, h_t=None, eps=1e-5, multiply=True):
    b, c, h, w = Base.shape
    d_model = c
    pooled = jnp.mean(Base * y_, axis=(2, 3))                         # (B, C)
    base = pooled @ params["wb"].T + params["bb"]
    if h_t is not None:
        base = base + h_t @ params["wh"].T
    logits = jnp.tanh(base) @ params["wfc"].T + params["bfc"]
    alpha = jax.nn.softmax(logits, axis=1) * d_model                  # (B, C)
    if not multiply:
        return alpha.reshape(b, c, 1, 1)
    scaled = Base * alpha[:, :, None, None]
    inv = jax.lax.rsqrt(params["bn_var"] + eps)
    paste = ((scaled - params["bn_mean"][None, :, None, None])
             * (inv * params["bn_gamma"])[None, :, None, None]
             + params["bn_beta"][None, :, None, None])
    return Base + paste


def init_params(key, d_model, reduction=2):
    r = d_model // reduction
    k = jax.random.split(key, 5)
    lim_c = 1.0 / jnp.sqrt(d_model)
    lim_r = 1.0 / jnp.sqrt(r)
    return {
        "wb": jax.random.uniform(k[0], (r, d_model), jnp.float32, -lim_c, lim_c),
        "bb": jax.random.uniform(k[1], (r,), jnp.float32, -lim_c, lim_c),
        "wh": jax.random.uniform(k[2], (r, d_model), jnp.float32, -lim_c, lim_c),
        "wfc": jax.random.uniform(k[3], (d_model, r), jnp.float32, -lim_r, lim_r),
        "bfc": jax.random.uniform(k[4], (d_model,), jnp.float32, -lim_r, lim_r),
        "bn_gamma": jnp.ones((d_model,), jnp.float32),
        "bn_beta": jnp.zeros((d_model,), jnp.float32),
        "bn_mean": jnp.zeros((d_model,), jnp.float32),
        "bn_var": jnp.ones((d_model,), jnp.float32),
    }


if __name__ == "__main__":
    key = jax.random.PRNGKey(0)
    k_base, k_y, k_p, k_h = jax.random.split(key, 4)

    B, C, H, W = 2, 8, 16, 16                     # d_model = C = 8, reduction = 2
    Base = jax.random.normal(k_base, (B, C, H, W), jnp.float32)
    y_ = jax.random.uniform(k_y, (B, 1, H, W), jnp.float32)   # mask, broadcast over C
    params = init_params(k_p, C, reduction=2)

    # 1) fused single-pass path, h_t=None, f32
    out = jax.block_until_ready(channel_attention_layer(Base, y_, params))
    ref = _reference(Base, y_, params)
    assert out.shape == (B, C, H, W)
    assert jnp.allclose(out, ref, atol=1e-4, rtol=1e-4), "fused path mismatch"

    # 2) fused path with h_t
    h_t = jax.random.normal(k_h, (B, C), jnp.float32)
    out_h = jax.block_until_ready(channel_attention_layer(Base, y_, params, h_t=h_t))
    ref_h = _reference(Base, y_, params, h_t=h_t)
    assert jnp.allclose(out_h, ref_h, atol=1e-4, rtol=1e-4), "h_t path mismatch"

    # 3) two-pass HW-tiled fallback (forced) — used when block exceeds VMEM budget
    out_2p = jax.block_until_ready(
        channel_attention_layer(Base, y_, params, force_two_pass=True, hw_tile=128))
    assert jnp.allclose(out_2p, ref, atol=1e-4, rtol=1e-4), "two-pass path mismatch"

    # 4) native bf16 in / bf16 out through the fused kernel (f32 accumulation inside)
    Base_bf = Base.astype(jnp.bfloat16)
    y_bf = y_.astype(jnp.bfloat16)
    out_bf = jax.block_until_ready(channel_attention_layer(Base_bf, y_bf, params))
    ref_bf = _reference(Base_bf.astype(jnp.float32), y_bf.astype(jnp.float32), params)
    assert out_bf.dtype == jnp.bfloat16
    assert jnp.allclose(out_bf.astype(jnp.float32), ref_bf, atol=5e-2, rtol=5e-2), \
        "bf16 path mismatch"

    # 5) multiply=False branch (returns alpha)
    alpha = jax.block_until_ready(
        channel_attention_layer(Base, y_, params, multiply=False))
    ref_alpha = _reference(Base, y_, params, multiply=False)
    assert alpha.shape == (B, C, 1, 1)
    assert jnp.allclose(alpha, ref_alpha, atol=1e-4, rtol=1e-4), "alpha mismatch"

    print("KERNEL_OK")
</pallas_src>

<mosaic_0001>
module attributes {stable_mosaic.version = 11 : i64} {
  func.func @_fused_kernel(%arg0: i32, %arg1: memref<1x8x256xf32, #tpu.memory_space<vmem>>, %arg2: memref<1x1x256xf32, #tpu.memory_space<vmem>>, %arg3: memref<8x4xf32, #tpu.memory_space<vmem>>, %arg4: memref<1x4xf32, #tpu.memory_space<vmem>>, %arg5: memref<4x8xf32, #tpu.memory_space<vmem>>, %arg6: memref<1x8xf32, #tpu.memory_space<vmem>>, %arg7: memref<1x8xf32, #tpu.memory_space<vmem>>, %arg8: memref<1x8xf32, #tpu.memory_space<vmem>>, %arg9: memref<1x8x256xf32, #tpu.memory_space<vmem>>) attributes {dimension_semantics = [#tpu.dimension_semantics<parallel>], iteration_bounds = array<i64: 2>, scalar_prefetch = 0 : i64, scratch_operands = 0 : i64, tpu.core_type = #tpu.core_type<tc>, window_params = [{transform_indices = @transform_0, window_bounds = array<i64: 1, 8, 256>}, {transform_indices = @transform_1, window_bounds = array<i64: 1, 1, 256>}, {pipeline_mode = #tpu.pipeline_mode<synchronous>, transform_indices = @transform_2, window_bounds = array<i64: 8, 4>}, {pipeline_mode = #tpu.pipeline_mode<synchronous>, transform_indices = @transform_3, window_bounds = array<i64: 1, 4>}, {pipeline_mode = #tpu.pipeline_mode<synchronous>, transform_indices = @transform_4, window_bounds = array<i64: 4, 8>}, {pipeline_mode = #tpu.pipeline_mode<synchronous>, transform_indices = @transform_5, window_bounds = array<i64: 1, 8>}, {pipeline_mode = #tpu.pipeline_mode<synchronous>, transform_indices = @transform_6, window_bounds = array<i64: 1, 8>}, {pipeline_mode = #tpu.pipeline_mode<synchronous>, transform_indices = @transform_7, window_bounds = array<i64: 1, 8>}, {transform_indices = @transform_8, window_bounds = array<i64: 1, 8, 256>}]} {
    %c0 = arith.constant 0 : index
    %c0_0 = arith.constant 0 : index
    %c0_1 = arith.constant 0 : index
    %0 = vector.load %arg1[%c0, %c0_0, %c0_1] : memref<1x8x256xf32, #tpu.memory_space<vmem>>, vector<1x8x256xf32>
    %c0_2 = arith.constant 0 : index
    %c0_3 = arith.constant 0 : index
    %c0_4 = arith.constant 0 : index
    %1 = vector.load %arg2[%c0_2, %c0_3, %c0_4] : memref<1x1x256xf32, #tpu.memory_space<vmem>>, vector<1x1x256xf32>
    %2 = vector.broadcast %1 : vector<1x1x256xf32> to vector<1x8x256xf32>
    %3 = arith.mulf %0, %2 : vector<1x8x256xf32>
    %cst = arith.constant dense<0.000000e+00> : vector<1x8xf32>
    %4 = vector.multi_reduction <add>, %3, %cst [2] : vector<1x8x256xf32> to vector<1x8xf32>
    %cst_5 = arith.constant 3.906250e-03 : f32
    %5 = vector.broadcast %cst_5 : f32 to vector<1x8xf32>
    %6 = arith.mulf %4, %5 : vector<1x8xf32>
    %c0_6 = arith.constant 0 : index
    %c0_7 = arith.constant 0 : index
    %7 = vector.load %arg3[%c0_6, %c0_7] : memref<8x4xf32, #tpu.memory_space<vmem>>, vector<8x4xf32>
    %cst_8 = arith.constant dense<0.000000e+00> : vector<1x4xf32>
    %8 = tpu.matmul %6, %7, %cst_8 {dimension_numbers = #tpu.dot_dimension_numbers<[1], [0], [0], [1], [0, 0, 1, 1], [], []>} : vector<1x8xf32>, vector<8x4xf32>, vector<1x4xf32> -> vector<1x4xf32>
    %c0_9 = arith.constant 0 : index
    %c0_10 = arith.constant 0 : index
    %9 = vector.load %arg4[%c0_9, %c0_10] : memref<1x4xf32, #tpu.memory_space<vmem>>, vector<1x4xf32>
    %10 = arith.addf %8, %9 : vector<1x4xf32>
    %11 = math.tanh %10 : vector<1x4xf32>
    %c0_11 = arith.constant 0 : index
    %c0_12 = arith.constant 0 : index
    %12 = vector.load %arg5[%c0_11, %c0_12] : memref<4x8xf32, #tpu.memory_space<vmem>>, vector<4x8xf32>
    %cst_13 = arith.constant dense<0.000000e+00> : vector<1x8xf32>
    %13 = tpu.matmul %11, %12, %cst_13 {dimension_numbers = #tpu.dot_dimension_numbers<[1], [0], [0], [1], [0, 0, 1, 1], [], []>} : vector<1x4xf32>, vector<4x8xf32>, vector<1x8xf32> -> vector<1x8xf32>
    %c0_14 = arith.constant 0 : index
    %c0_15 = arith.constant 0 : index
    %14 = vector.load %arg6[%c0_14, %c0_15] : memref<1x8xf32, #tpu.memory_space<vmem>>, vector<1x8xf32>
    %15 = arith.addf %13, %14 : vector<1x8xf32>
    %cst_16 = arith.constant dense<0xFF800000> : vector<1xf32>
    %16 = vector.multi_reduction <maximumf>, %15, %cst_16 [1] : vector<1x8xf32> to vector<1xf32>
    %17 = vector.shape_cast %16 : vector<1xf32> to vector<1x1xf32>
    %18 = vector.broadcast %17 : vector<1x1xf32> to vector<1x8xf32>
    %19 = arith.subf %15, %18 : vector<1x8xf32>
    %20 = math.exp %19 : vector<1x8xf32>
    %cst_17 = arith.constant dense<0.000000e+00> : vector<1xf32>
    %21 = vector.multi_reduction <add>, %20, %cst_17 [1] : vector<1x8xf32> to vector<1xf32>
    %22 = vector.shape_cast %21 : vector<1xf32> to vector<1x1xf32>
    %23 = vector.broadcast %22 : vector<1x1xf32> to vector<1x8xf32>
    %24 = arith.divf %20, %23 : vector<1x8xf32>
    %cst_18 = arith.constant 8.000000e+00 : f32
    %25 = vector.broadcast %cst_18 : f32 to vector<1x8xf32>
    %26 = arith.mulf %24, %25 : vector<1x8xf32>
    %c0_19 = arith.constant 0 : index
    %c0_20 = arith.constant 0 : index
    %27 = vector.load %arg7[%c0_19, %c0_20] : memref<1x8xf32, #tpu.memory_space<vmem>>, vector<1x8xf32>
    %28 = arith.mulf %26, %27 : vector<1x8xf32>
    %cst_21 = arith.constant 1.000000e+00 : f32
    %29 = vector.broadcast %cst_21 : f32 to vector<1x8xf32>
    %30 = arith.addf %29, %28 : vector<1x8xf32>
    %c0_22 = arith.constant 0 : index
    %c0_23 = arith.constant 0 : index
    %31 = vector.load %arg8[%c0_22, %c0_23] : memref<1x8xf32, #tpu.memory_space<vmem>>, vector<1x8xf32>
    %32 = vector.shape_cast %30 : vector<1x8xf32> to vector<1x8x1xf32>
    %33 = vector.broadcast %32 : vector<1x8x1xf32> to vector<1x8x256xf32>
    %34 = arith.mulf %0, %33 : vector<1x8x256xf32>
    %35 = vector.shape_cast %31 : vector<1x8xf32> to vector<1x8x1xf32>
    %36 = vector.broadcast %35 : vector<1x8x1xf32> to vector<1x8x256xf32>
    %37 = arith.addf %34, %36 : vector<1x8x256xf32>
    %c0_24 = arith.constant 0 : index
    %c0_25 = arith.constant 0 : index
    %c0_26 = arith.constant 0 : index
    %38 = vector.load %arg9[%c0_24, %c0_25, %c0_26] : memref<1x8x256xf32, #tpu.memory_space<vmem>>, vector<1x8x256xf32>
    tpu.vector_store %arg9[%c0_24, %c0_25, %c0_26], %37 {strides = array<i32>} : memref<1x8x256xf32, #tpu.memory_space<vmem>>, vector<1x8x256xf32>,
    return
  }
  func.func @transform_0(%arg0: i32) -> (i32, i32, i32) {
    %c0_i32 = arith.constant 0 : i32
    %c0_i32_0 = arith.constant 0 : i32
    %c0_i32_1 = arith.constant 0 : i32
    return %arg0, %c0_i32, %c0_i32_0 : i32, i32, i32
  }
  func.func @transform_1(%arg0: i32) -> (i32, i32, i32) {
    %c0_i32 = arith.constant 0 : i32
    %c0_i32_0 = arith.constant 0 : i32
    %c0_i32_1 = arith.constant 0 : i32
    return %arg0, %c0_i32, %c0_i32_0 : i32, i32, i32
  }
  func.func @transform_2(%arg0: i32) -> (i32, i32) {
    %c0_i32 = arith.constant 0 : i32
    %c0_i32_0 = arith.constant 0 : i32
    %c0_i32_1 = arith.constant 0 : i32
    return %c0_i32, %c0_i32_0 : i32, i32
  }
  func.func @transform_3(%arg0: i32) -> (i32, i32) {
    %c0_i32 = arith.constant 0 : i32
    %c0_i32_0 = arith.constant 0 : i32
    %c0_i32_1 = arith.constant 0 : i32
    return %c0_i32, %c0_i32_0 : i32, i32
  }
  func.func @transform_4(%arg0: i32) -> (i32, i32) {
    %c0_i32 = arith.constant 0 : i32
    %c0_i32_0 = arith.constant 0 : i32
    %c0_i32_1 = arith.constant 0 : i32
    return %c0_i32, %c0_i32_0 : i32, i32
  }
  func.func @transform_5(%arg0: i32) -> (i32, i32) {
    %c0_i32 = arith.constant 0 : i32
    %c0_i32_0 = arith.constant 0 : i32
    %c0_i32_1 = arith.constant 0 : i32
    return %c0_i32, %c0_i32_0 : i32, i32
  }
  func.func @transform_6(%arg0: i32) -> (i32, i32) {
    %c0_i32 = arith.constant 0 : i32
    %c0_i32_0 = arith.constant 0 : i32
    %c0_i32_1 = arith.constant 0 : i32
    return %c0_i32, %c0_i32_0 : i32, i32
  }
  func.func @transform_7(%arg0: i32) -> (i32, i32) {
    %c0_i32 = arith.constant 0 : i32
    %c0_i32_0 = arith.constant 0 : i32
    %c0_i32_1 = arith.constant 0 : i32
    return %c0_i32, %c0_i32_0 : i32, i32
  }
  func.func @transform_8(%arg0: i32) -> (i32, i32, i32) {
    %c0_i32 = arith.constant 0 : i32
    %c0_i32_0 = arith.constant 0 : i32
    %c0_i32_1 = arith.constant 0 : i32
    return %arg0, %c0_i32, %c0_i32_0 : i32, i32, i32
  }
}

</mosaic_0001>

<bundles_post_ra>
// kernel: tpu_custom_call.1
= control target key start
LH: loop header
LB: loop body
LE: loop exit
PB: predicated region body
PF: predicated region fallthrough
CT: control target
= control target key end

     0   :  { %13 = vsyncpa [#allocation3], 0  ;;  %s945_s0 = inlined_call_operand.hbm [shape: f32[2,8,256], index: 0, kind: input, shape index: {}]   ;;  %s946_s1 = inlined_call_operand.vmem [shape: f32[2,1,256], index: 1, kind: input, shape index: {}]   ;;  %s947_s2 = inlined_call_operand.vmem [shape: f32[8,4], index: 2, kind: input, shape index: {}]   ;;  %s948_s3 = inlined_call_operand.vmem [shape: f32[1,4], index: 3, kind: input, shape index: {}]   ;;  %s949_s4 = inlined_call_operand.vmem [shape: f32[4,8], index: 4, kind: input, shape index: {}]   ;;  %s950_s5 = inlined_call_operand.vmem [shape: f32[1,8], index: 5, kind: input, shape index: {}]   ;;  %s951_s6 = inlined_call_operand.vmem [shape: f32[1,8], index: 6, kind: input, shape index: {}]   ;;  %s952_s7 = inlined_call_operand.vmem [shape: f32[1,8], index: 7, kind: input, shape index: {}]   ;;  %s953_s8 = inlined_call_operand.hbm [shape: f32[2,8,256], index: 8, kind: output, shape index: {}]  }
   0x1   :  { %15 = vsyncpa [#allocation3 + $0x1], 0 }
   0x2   :  { %16 = vsyncpa [#allocation4], 0 }
   0x3   :  { %18 = vsyncpa [#allocation4 + $0x1], 0  ;;  %s783_s27 = smov 0   ;;  %s785_s28 = smov 0  }
   0x4   :  { %s787_s29 = smov 0   ;;  %s789_s30 = smov 0  }
   0x5 LB: > { %955 = sst [smem:[#allocation8_spill]] %s732_s29  ;;  %s804_s9 = sadd.s32 4294967295, %s736_s30   ;;  %s736_s30 = sphi %s789_s30, %s967_s30   ;;  %s732_s29 = sphi %s787_s29, %s964_s29   ;;  %s728_s28 = sphi %s785_s28, %s966_s28   ;;  %s724_s27 = sphi %s783_s27, %s965_s27  }
   0x6   : > { %s564_s10 = sadd.s32 4294967294, %s736_s30   ;;  %s808_s11 = sadd.s32 1, %s736_s30  }
   0x7   : > { %s31_s12 = sadd.s32 1, %s732_s29  ;;  %s28_s13 = ssub.s32 %s736_s30, %s808_s11 }
   0x8   : > { %p38_p0 = scmp.ne.s32.totalorder %s732_s29, %s728_s28  ;;  %p29_p1 = scmp.eq.s32.totalorder %s28_s13, 0 }
   0x9   : > { %p39_p2 = scmp.eq.s32.totalorder %s736_s30, 0  ;;  %p44_p3 = scmp.ne.s32.totalorder %s728_s28, %s724_s27 }
   0xa   : > { %p45_p4 = scmp.eq.s32.totalorder %s804_s9, 0  ;;  %p220_p7 = scmp.eq.s32.totalorder %s804_s9, 1 }
   0xb   : > { %s820_s14 = scalar_select %p29_p1, %s732_s29, %s31_s12  }
   0xc   : > { %p822_p5 = por %p39_p2, %p38_p0  ;;  %p826_p6 = por %p45_p4, %p44_p3 }
   0xd   : > { %956 = sst [smem:[#allocation9_spill]] %s820_s14  ;;  %p226_p8 = scmp.eq.s32.totalorder %s564_s10, 1 }
   0xe   : > { %p596_p10 = scmp.lt.s32.totalorder %s736_s30, 2  ;;  %p833_p11 = por %p220_p7, %p38_p0 }
   0xf   : > { %p837_p12 = por %p226_p8, %p44_p3  ;;  %s264_s19 = sand.u32 1, %s732_s29  }
  0x10   : > { %s582_s20 = sshll.u32 %s736_s30, 4  ;;  %s567_s21 = sshll.u32 %s264_s19, 4 }
  0x11   : > { %s273_s24 = scalar_lea.hbm %s945_s0, %s582_s20  ;;  %s268_s26 = scalar_lea.vmem [#allocation2], %s567_s21 }
  0x12   : > { %s275_s25 = sshll.u32 %s273_s24, 4  ;;  %s277_s10 = sshll.u32 %s268_s26, 4  ;;  %s276_s25 = int_to_ptr.hbm [resolvable:$true] %s275_s25  ;;  %s278_s10 = int_to_ptr.vmem [resolvable:$true] %s277_s10 }
  0x13   : > { %p848_p13 = pnand %p596_p10, %p822_p5  ;;  %p570_p0 = scmp.ge.s32.totalorder %s736_s30, 1 }
  0x14   : > { %p289_p1 = scmp.lt.s32.totalorder %s736_s30, 3  ;;  %s265_s13 = scalar_lea.sflag [#allocation3], %s264_s19 }
  0x15   : > { %s640_s14 = sshra.s32 %s276_s25, 4  ;;  %p644_p3 = pneg %p848_p13  ;;  %s641_s14 = int_to_ptr.hbm [resolvable:$true] %s640_s14 }
  0x16   : > { %s642_s29 = scalar_lea.hbm %s641_s14, 16  ;;  %s647_s15 = scalar_lea.hbm %s945_s0, 32 }
  0x17   : > { %p643_p2 = scmp.ne.s32.totalorder %s641_s14, %s642_s29  ;;  %p648_p5 = scmp.lt.s32.totalorder %s641_s14, %s945_s0 }
  0x18   : > { %p649_p8 = scmp.lt.s32.totalorder %s647_s15, %s642_s29 }
  0x19   : > { %p645_p4 = pnand %p644_p3, %p643_p2 }
  0x1a   : > { %p650_p10 = por %p649_p8, %p648_p5 }
  0x1b   : > { %p646_p7 = pneg %p645_p4 }
  0x1d   : > { %p651_p9 = pnand %p650_p10, %p646_p7 }
  0x1f   : > { %654 = shalt.err (!%p651_p9)
}
  0x20   : > { %591 = dma.hbm_to_vmem [thread:$0]  (!%p848_p13), %s276_s25, 256, %s278_s10, %s265_s13  }
  0x21   : > { %p290_p2 = pnand %p570_p0, %p289_p1 }
  0x22   : > { %s869_s19 = sand.u32 (!%p290_p2), 1, %s728_s28  }
  0x23   : > { %293 = sbr.rel (%p290_p2) target bundleno = 832 (0x340), region = 52  ;;  %s571_s29 = sshll.u32 (!%p290_p2), %s869_s19, 4 }
  0x24   : > { %s296_s14 = scalar_lea.sflag (!%p290_p2), [#allocation3], %s869_s19  ;;  %s299_s24 = scalar_lea.vmem (!%p290_p2), [#allocation2], %s571_s29 }
  0x28   : > { %715 = dma.done.wait (%p826_p6), %s296_s14, 256  }
  0x29   : > { %717 = vsyncadd (%p826_p6), %s296_s14, 4294967040  ;;  %p337_p9 = scmp.lt.s32.totalorder %s804_s9, 1  ;;  %v884_v0 = vld [vmem:[%s299_s24] sm:$0xff]  ;;  %v886_v1 = vld [vmem:[%s299_s24 + $0x8] sm:$0xff]  ;;  %v358_v9 = vlaneseq  ;;  %vm361_vm0 = vcmask 64512   ;;  %vm391_vm1 = vcmask 1043456  }
  0x2a   : > { %v355_v8 = vld [vmem:[%s947_s2] sm:$0xff]  ;;  %vm387_vm2 = vcmask 31744   ;;  %vm415_vm3 = vcmask 57344   ;;  %s336_s15 = scalar_lea.vmem [#allocation5], %s571_s29  ;;  %s690_s29 = scalar_lea.hbm %s953_s8, 32 }
  0x2b   : > { %s338_s25 = scalar_select %p337_p9, %s804_s9, 1  ;;  %379 = vmatpush.msra.mxu0 %v355_v8  ;;  %v359_v10 = vand.u32 127, %v358_v9  ;;  %v385_v14 = vld [vmem:[%s949_s4] sm:$0xf]  ;;  %v447_v28 = vshrl.u32 %v358_v9, 7 }
  0x2c   : > { %575 = vmatpush.msk.msra.mxu1 %vm391_vm1, %v385_v14  ;;  %v356_v15 = vld [vmem:[%s948_s3] sm:$0x1]  ;;  %s479_s22 = sshll.u32 %s336_s15, 4  ;;  %s480_s22 = int_to_ptr.vmem [resolvable:$true] %s479_s22 }
  0x2d   : > { %s573_s26 = sshll.u32 %s338_s25, 1  ;;  %v386_v19 = vld [vmem:[%s950_s5] sm:$0x1]  ;;  %630 = vset.pattern.permute.xlu1 %v447_v28  ;;  %631 = vset.pattern.permute.xlu2 %v447_v28 }
  0x2e   : > { %s340_s13 = scalar_lea.vmem %s946_s1, %s573_s26  ;;  %632 = vset.pattern.permute.xlu0 %v447_v28  ;;  %v633_v29 = vld [vmem:[%s952_s7] ss:$0 sm:$0xff] }
  0x2f   : > { %v343_v2 = vld [vmem:[%s340_s13] sm:$0x3]  ;;  %s583_s13 = sshll.u32 %s804_s9, 4  ;;  %s466_s9 = scalar_lea.sflag [#allocation4], %s869_s19 }
  0x30   : > { %v345_v3 = vperm.slane %v343_v2, 0  ;;  %v346_v4 = vperm.slane %v343_v2, 1  ;;  %v441_v42 = vld [vmem:[%s951_s6] sm:$0x1]  ;;  %s477_s21 = scalar_lea.hbm %s953_s8, %s583_s13 }
  0x31   : > { %s481_s23 = sshll.u32 %s477_s21, 4  ;;  %s482_s23 = int_to_ptr.hbm [resolvable:$true] %s481_s23 }
  0x32   : > { %v349_v5 = vmul.f32 %v345_v3, %v884_v0  ;;  %v350_v6 = vmul.f32 %v346_v4, %v886_v1  ;;  %s684_s14 = sshra.s32 %s482_s23, 4  ;;  %s685_s14 = int_to_ptr.hbm [resolvable:$true] %s684_s14 }
  0x33   : > { %s686_s24 = scalar_lea.hbm %s685_s14, 16  ;;  %p691_p1 = scmp.lt.s32.totalorder %s685_s14, %s953_s8 }
  0x34   : > { %v351_v7 = vadd.f32 %v350_v6, %v349_v5  ;;  %p687_p6 = scmp.ne.s32.totalorder %s685_s14, %s686_s24  ;;  %p692_p3 = scmp.lt.s32.totalorder %s690_s29, %s686_s24 }
  0x35   : > { %459 = vperm.xlu2 %631, %v633_v29  }
  0x36   : > { %352 = vadd.xlane.f32.xlu0 %v351_v7  ;;  %p688_p13 = pnand %p687_p6, %p833_p11  ;;  %p693_p4 = por %p692_p3, %p691_p1 }
  0x38   : > { %p689_p0 = pneg %p688_p13 }
  0x3a   : > { %p694_p7 = pnand %p693_p4, %p689_p0 }
  0x8f   : > { %v460_v48 = vpop.permute.xlu2 %459 }
  0xa9   : > { %v353_v11 = vpop.xlane.xlu0 %352 }
  0xaa   : > { %v354_v12 = vmul.f32 0.00390625, %v353_v11 }
  0xac   : > { %v360_v13 = vperm.slane %v354_v12, %v359_v10 }
  0xae   : > { %574 = vmatmul.msk.f32.vlgmr.msra.gmra.mxu0 %vm361_vm0, %v360_v13 }
 0x12b   : > { %v381_v16 = vpop.f32.mrf.mxu0 }
 0x12c   : > { %v382_v17 = vadd.f32 %v381_v16, %v356_v15 }
 0x12e   : > { %634 = vtanh.f32 %v382_v17 }
 0x134   : > { %v635_v18 = vpop.eup %634 }
 0x135   : > { %576 = vmatmul.msk.f32.vlgmr.msra.gmra.mxu1 %vm387_vm2, %v635_v18 }
 0x1b2   : > { %v412_v20 = vpop.f32.mrf.mxu1 }
 0x1b3   : > { %v413_v21 = vadd.f32 %v412_v20, %v386_v19 }
 0x1b5   : > { %v416_v22 = vsel %vm415_vm3, %v413_v21, -inf }
 0x1b6   : > { %417 = vmax.xlane.f32.xlu0 %v416_v22 }
 0x229   : > { %v418_v23 = vpop.xlane.xlu0 %417 }
 0x22a   : > { %v419_v24 = vsub.f32 %v413_v21, %v418_v23 }
 0x22c   : > { %v420_v25 = vmul.f32 1.442695, %v419_v24 }
 0x22e   : > { %636 = vpow2.f32 %v420_v25 }
 0x234   : > { %v637_v26 = vpop.eup %636 }
 0x235   : > { %v422_v27 = vsel %vm415_vm3, %v637_v26, 0.0 }
 0x236   : > { %423 = vadd.xlane.f32.xlu1 %v422_v27 }
 0x2a9   : > { %v424_v30 = vpop.xlane.xlu1 %423 }
 0x2aa   : > { %638 = vrcp.f32 %v424_v30  ;;  %v436_v34 = vand.u32 2147483648, %v424_v30  ;;  %v434_v36 = vand.u32 2147483647, %v424_v30  ;;  %vm430_vm5 = vweird.f32 %v424_v30 }
 0x2ac   : > { %v437_v38 = vor.u32 1.1754944e-38, %v436_v34  ;;  %vm435_vm7 = vcmp.eq.f32.partialorder %v434_v36, 8.507059e+37 }
 0x2b0   : > { %v639_v31 = vpop.eup %638 }
 0x2b1   : > { %v426_v32 = vmul.f32 %v639_v31, %v424_v30  ;;  %vm431_vm4 = vweird.f32 %v639_v31 }
 0x2b2   : > { %vm432_vm6 = vmor %vm430_vm5, %vm431_vm4 }
 0x2b3   : > { %v427_v33 = vsub.f32 1.0, %v426_v32 }
 0x2b5   : > { %v428_v35 = vmul.f32 %v639_v31, %v427_v33 }
 0x2b7   : > { %v429_v37 = vadd.f32 %v639_v31, %v428_v35 }
 0x2b9   : > { %v433_v39 = vsel %vm432_vm6, %v639_v31, %v429_v37 }
 0x2ba   : > { %v438_v40 = vsel %vm435_vm7, %v437_v38, %v433_v39 }
 0x2bb   : > { %v439_v41 = vmul.f32 %v637_v26, %v438_v40 }
 0x2bd   : > { %v440_v43 = vmul.f32 8.0, %v439_v41 }
 0x2bf   : > { %v442_v44 = vmul.f32 %v441_v42, %v440_v43 }
 0x2c1   : > { %v443_v45 = vadd.f32 1.0, %v442_v44 }
 0x2c3   : > { %v445_v46 = vperm.slane %v443_v45, 0 }
 0x2c5   : > { %450 = vperm.xlu1 %630, %v445_v46  }
 0x337   : > { %v451_v47 = vpop.permute.xlu1 %450 }
 0x338   : > { %v452_v49 = vmul.f32 %v451_v47, %v884_v0  ;;  %v453_v50 = vmul.f32 %v451_v47, %v886_v1 }
 0x33a   : > { %v461_v51 = vadd.f32 %v460_v48, %v452_v49  ;;  %v462_v52 = vadd.f32 %v460_v48, %v453_v50 }
 0x33c   : > { %463 = vst [vmem:[%s336_s15] sm:$0xff] %v461_v51 }
 0x33d   : > { %464 = vst [vmem:[%s336_s15 + $0x8] sm:$0xff] %v462_v52 }
 0x33e   : > { %697 = shalt.err (!%p694_p7)
}
 0x33f   : > { %586 = dma.vmem_to_hbm [thread:$0]  (%p833_p11), %s480_s22, 256, %s482_s23, %s466_s9  }
 0x340 PF: > { %s493_s19 = sand.u32 1, %s724_s27   ;;  %p962_p5 = scmp.ge.s32.totalorder %s736_s30, 2 }
 0x341   : > { %s494_s13 = scalar_lea.sflag [#allocation4], %s493_s19 }
 0x342   : > { %p593_p8 = pnand %p962_p5, %p837_p12 }
 0x344   : > { %p594_p10 = pneg %p593_p8 }
 0x346   : > { %719 = dma.done.wait (%p594_p10), %s494_s13, 256  }
 0x347   : > { %721 = vsyncadd (%p594_p10), %s494_s13, 4294967040  ;;  %s963_s16 = sld [smem:[#allocation8_spill]]  ;;  %p21_p2 = scmp.ge.s32.totalorder %s808_s11, 4  }
 0x348   : > { %s964_s29 = sld [smem:[#allocation9_spill]]  ;;  %s965_s27 = smov %s728_s28 }
 0x349   : > { %s967_s30 = smov %s808_s11  ;;  %23 = sbr.rel (!%p21_p2) target bundleno = 5 (0x5), region = 100 }
 0x34d   : > { %s966_s28 = smov %s963_s16 }
 0x34e   :  { %500 = vsyncpa [#allocation3], 1 }
 0x34f   :  { %502 = vsyncpa [#allocation3 + $0x1], 1 }
 0x350   :  { %503 = vsyncpa [#allocation4], 1 }
 0x351   :  { %505 = vsyncpa [#allocation4 + $0x1], 1 }

</bundles_post_ra>
